<compile_context>
chip_gen: v6e
topology: v6e:2x2x1
jax: 0.10.0
libtpu: 0.0.40
codegen_flags: <defaults>
</compile_context>

<pallas_src>
import jax
import jax.numpy as jnp
import numpy as np
from jax import lax
from jax.experimental import pallas as pl
from jax.experimental.pallas import tpu as pltpu

EPS = 1e-5


# ----------------------------------------------------------------------------
# Host-side helpers
# ----------------------------------------------------------------------------
def _tap_offsets(dilation):
    # 3x3 dilated-conv tap offsets (padding == dilation), fixed at trace time.
    return [((kh - 1) * dilation, (kw - 1) * dilation)
            for kh in range(3) for kw in range(3)]


def make_tap_masks(H, W, dilation):
    """Validity masks for the 9 dilated taps, precomputed once on the host.

    Returns a (9, H*W) float32 array of 0/1; identical for every image and
    every grid step, so it is passed as a grid-invariant kernel input.
    """
    HW = H * W
    pos = np.arange(HW)
    row, col = pos // W, pos % W
    masks = np.stack(
        [((row + dh >= 0) & (row + dh < H) & (col + dw >= 0) & (col + dw < W))
         for dh, dw in _tap_offsets(dilation)]).astype(np.float32)
    return jnp.asarray(masks)


def _pick_batch_block(B):
    # Largest divisor of B in {8, 4, 2, 1} that keeps >= 2 grid steps, so the
    # 'parallel' batch axis can be sharded across both v7x TensorCores.
    for blk in (8, 4, 2, 1):
        if B % blk == 0 and (B // blk) >= 2:
            return blk
    return 1


# ----------------------------------------------------------------------------
# Pallas kernel
# ----------------------------------------------------------------------------
def make_spatial_gate_kernel(H, W, dilation, batch_block):
    HW = H * W
    shifts = [dh * W + dw for dh, dw in _tap_offsets(dilation)]

    def kernel(x_ref, m_ref, w1_ref, b1_ref,
               w2a_ref, sa_ref, ta_ref,
               w2b_ref, sb_ref, tb_ref,
               w3_ref, b3_ref, o_ref):
        # Grid-invariant operands: hoisted once per grid step and shared by
        # every image of the batch block.
        mask_rows = [m_ref[pl.ds(t, 1), :] for t in range(9)]   # 9 x (1, HW) f32
        w1 = w1_ref[...]            # (CRP, C)  bf16
        b1 = b1_ref[...]            # (CRP, 1)  f32
        w2a = w2a_ref[...]; sa = sa_ref[...]; ta = ta_ref[...]
        w2b = w2b_ref[...]; sb = sb_ref[...]; tb = tb_ref[...]
        w3 = w3_ref[...]; b3 = b3_ref[...]

        def im2col(y):
            # 9 shifted + masked copies stacked along the contraction axis.
            # pltpu.roll uses the XLU slot; masks reproduce zero padding.
            # Masking stays in f32 (no bf16 VALU on v5e); one cast of the
            # concatenated buffer feeds the bf16 MXU operand.
            cols = []
            for t, d in enumerate(shifts):
                z = y if d == 0 else pltpu.roll(y, (-d) % HW, axis=1)
                cols.append(z * mask_rows[t])
            return jnp.concatenate(cols, axis=0).astype(jnp.bfloat16)

        def dilated_block(y, w, s, t):
            # Whole 3x3 dilated conv as ONE bf16 matmul (K = 9*CRP), f32
            # accumulation, then folded (conv-bias + eval-mode BN) scale/shift
            # and ReLU in f32.
            acc = jnp.dot(w, im2col(y), preferred_element_type=jnp.float32)
            return jnp.maximum(acc * s + t, 0.0)

        # Statically unrolled loop over the images of this grid step: the
        # per-step pipeline overhead and the hoisted loads above are
        # amortised over batch_block images.
        for b in range(batch_block):
            x = x_ref[b]                                      # (C, HW) bf16
            # conv1 (1x1): (CRP, C) @ (C, HW) -> (CRP, HW), lane-dense.
            y = jnp.dot(w1, x, preferred_element_type=jnp.float32) + b1
            # conv2: two [dilated conv -> BN -> ReLU] blocks.
            y = dilated_block(y, w2a, sa, ta)
            y = dilated_block(y, w2b, sb, tb)
            # conv3 (1x1, CR -> 1) + final BN folded into w3/b3.  K is tiny
            # (CRP = 8): VPU weighted sum + sublane reduce instead of another
            # tiny MXU push/drain.  Output is the gate only.
            gate = jnp.sum(y * w3, axis=0, keepdims=True) + b3
            o_ref[b] = gate.astype(o_ref.dtype)               # (1, HW), lane-dense

    return kernel


def spatial_gate_pallas(x_nchw, kparams, *, dilation, batch_block=None):
    B, C, H, W = x_nchw.shape
    HW = H * W
    # The flat-shift trick assumes padding == dilation and dilation < H, W.
    assert dilation < H and dilation < W, "requires dilation < H and < W"

    if batch_block is None:
        batch_block = _pick_batch_block(B)
    assert B % batch_block == 0
    grid_b = B // batch_block

    # In a real model the activations would already be bf16; the explicit
    # cast here halves the kernel's HBM read + VMEM footprint for x.
    x_flat = x_nchw.reshape(B, C, HW).astype(jnp.bfloat16)

    masks = make_tap_masks(H, W, dilation)                     # (9, HW) f32

    operands = (masks,
                kparams["w1"], kparams["b1"],
                kparams["w2a"], kparams["s2a"], kparams["t2a"],
                kparams["w2b"], kparams["s2b"], kparams["t2b"],
                kparams["w3"], kparams["b3"])

    in_specs = [pl.BlockSpec((batch_block, C, HW), lambda nb: (nb, 0, 0))]
    # Grid-invariant inputs: constant index_map -> fetched once, not re-DMA'd.
    in_specs += [pl.BlockSpec(op.shape, lambda nb: (0, 0)) for op in operands]

    gate = pl.pallas_call(
        make_spatial_gate_kernel(H, W, dilation, batch_block),
        out_shape=jax.ShapeDtypeStruct((B, 1, HW), jnp.float32),
        grid=(grid_b,),
        in_specs=in_specs,
        out_specs=pl.BlockSpec((batch_block, 1, HW), lambda nb: (nb, 0, 0)),
        compiler_params=pltpu.CompilerParams(
            dimension_semantics=("parallel",)),
    )(x_flat, *operands)

    # expand_as(x): broadcast the 1-channel gate over C.  XLA fuses this into
    # the consumer, so the full (B, C, H, W) tensor is not written back to
    # HBM by the gate computation itself.
    return jnp.broadcast_to(gate.reshape(B, 1, H, W), (B, C, H, W))


# ----------------------------------------------------------------------------
# Deterministic synthetic parameters (torch OIHW layout) + kernel packing
# ----------------------------------------------------------------------------
def init_params(key, C, CR):
    ks = jax.random.split(key, 24)
    n = lambda k, s: 0.1 * jax.random.normal(k, s, dtype=jnp.float32)
    p = {}
    p["w1"] = n(ks[0], (CR, C, 1, 1));  p["b1"] = n(ks[1], (CR,))
    p["w2a"] = n(ks[2], (CR, CR, 3, 3)); p["b2a"] = n(ks[3], (CR,))
    p["g2a"] = 1.0 + n(ks[4], (CR,));    p["be2a"] = n(ks[5], (CR,))
    p["m2a"] = n(ks[6], (CR,))
    p["v2a"] = 0.5 + jax.random.uniform(ks[7], (CR,), dtype=jnp.float32)
    p["w2b"] = n(ks[8], (CR, CR, 3, 3)); p["b2b"] = n(ks[9], (CR,))
    p["g2b"] = 1.0 + n(ks[10], (CR,));   p["be2b"] = n(ks[11], (CR,))
    p["m2b"] = n(ks[12], (CR,))
    p["v2b"] = 0.5 + jax.random.uniform(ks[13], (CR,), dtype=jnp.float32)
    p["w3"] = n(ks[14], (1, CR, 1, 1));  p["b3"] = n(ks[15], (1,))
    p["g3"] = 1.0 + n(ks[16], (1,));     p["be3"] = n(ks[17], (1,))
    p["m3"] = n(ks[18], (1,))
    p["v3"] = 0.5 + jax.random.uniform(ks[19], (1,), dtype=jnp.float32)
    return p


def pack_kernel_params(p, C, CR):
    """Pack torch-layout params into channel-major kernel weights.

    Hidden channels are zero-padded to CRP (multiple of 8 sublanes); padded
    rows carry zero weights / zero scale-shift so they stay identically zero
    through the whole pipeline.  Conv bias + eval-mode BN are folded into a
    single per-channel scale/shift; the final BN is folded into conv3.
    Matmul weights (w1, w2a, w2b) are stored in bf16 for the MXU; everything
    applied on the VPU stays f32.
    """
    CRP = max(8, ((CR + 7) // 8) * 8)

    def bn_scale_shift(g, be, m, v):
        s = g / jnp.sqrt(v + EPS)
        return s, be - m * s

    def pad0(a, n):   # zero-pad leading dim to n rows
        return jnp.pad(a, ((0, n - a.shape[0]),) + ((0, 0),) * (a.ndim - 1))

    s2a, t2a = bn_scale_shift(p["g2a"], p["be2a"], p["m2a"], p["v2a"])
    s2b, t2b = bn_scale_shift(p["g2b"], p["be2b"], p["m2b"], p["v2b"])
    sbn, tbn = bn_scale_shift(p["g3"], p["be3"], p["m3"], p["v3"])

    def pack_dilated(w, b, s, t):
        # torch OIHW (CR, CR, 3, 3) -> (CRP, 9*CRP), taps-major columns:
        # W[o, tap*CRP + i] = w[o, i, kh, kw]
        wk = jnp.transpose(w, (0, 2, 3, 1))                      # (O, KH, KW, I)
        wk = jnp.pad(wk, ((0, CRP - CR), (0, 0), (0, 0), (0, CRP - CR)))
        wk = wk.reshape(CRP, 9 * CRP).astype(jnp.bfloat16)       # MXU operand
        scale = pad0(s.reshape(CR, 1), CRP)                      # BN scale (f32)
        shift = pad0((b * s + t).reshape(CR, 1), CRP)            # bias*s + shift
        return wk, scale, shift

    w2a, s2a_f, t2a_f = pack_dilated(p["w2a"], p["b2a"], s2a, t2a)
    w2b, s2b_f, t2b_f = pack_dilated(p["w2b"], p["b2b"], s2b, t2b)

    return {
        "w1": pad0(p["w1"][:, :, 0, 0], CRP).astype(jnp.bfloat16),   # (CRP, C)
        "b1": pad0(p["b1"].reshape(CR, 1), CRP),                     # (CRP, 1)
        "w2a": w2a, "s2a": s2a_f, "t2a": t2a_f,                      # (CRP,9CRP),(CRP,1)x2
        "w2b": w2b, "s2b": s2b_f, "t2b": t2b_f,
        # conv3 + final BN folded; padded rows have zero weight (f32, VPU path).
        "w3": pad0((p["w3"][0, :, 0, 0] * sbn).reshape(CR, 1), CRP), # (CRP, 1)
        "b3": (p["b3"] * sbn + tbn).reshape(1, 1),                   # (1, 1)
    }


# ----------------------------------------------------------------------------
# Pure-JAX reference (PyTorch semantics, eval-mode BN), for verification
# ----------------------------------------------------------------------------
def spatial_gate_reference(x, p, *, dilation):
    def conv1x1(x, w, b):
        return jnp.einsum("bihw,oi->bohw", x, w[:, :, 0, 0]) \
            + b[None, :, None, None]

    def dconv(x, w, b):
        y = lax.conv_general_dilated(
            x, w, window_strides=(1, 1),
            padding=((dilation, dilation), (dilation, dilation)),
            rhs_dilation=(dilation, dilation),
            dimension_numbers=("NCHW", "OIHW", "NCHW"))
        return y + b[None, :, None, None]

    def bn(x, g, be, m, v):
        return (x - m[None, :, None, None]) \
            / jnp.sqrt(v[None, :, None, None] + EPS) \
            * g[None, :, None, None] + be[None, :, None, None]

    y = conv1x1(x, p["w1"], p["b1"])
    y = jnp.maximum(bn(dconv(y, p["w2a"], p["b2a"]),
                       p["g2a"], p["be2a"], p["m2a"], p["v2a"]), 0.0)
    y = jnp.maximum(bn(dconv(y, p["w2b"], p["b2b"]),
                       p["g2b"], p["be2b"], p["m2b"], p["v2b"]), 0.0)
    y = conv1x1(y, p["w3"], p["b3"])
    y = bn(y, p["g3"], p["be3"], p["m3"], p["v3"])
    return jnp.broadcast_to(y, x.shape)


# ----------------------------------------------------------------------------
if __name__ == "__main__":
    B, C, H, W = 2, 16, 16, 16
    REDUCTION, DILATION = 4, 4
    CR = C // REDUCTION

    key = jax.random.PRNGKey(0)
    kx, kp = jax.random.split(key)
    x = jax.random.normal(kx, (B, C, H, W), dtype=jnp.float32)

    params = init_params(kp, C, CR)
    kparams = pack_kernel_params(params, C, CR)

    out = jax.block_until_ready(
        spatial_gate_pallas(x, kparams, dilation=DILATION))
    ref = jax.block_until_ready(
        spatial_gate_reference(x, params, dilation=DILATION))

    assert out.shape == x.shape, (out.shape, x.shape)
    err = float(np.max(np.abs(np.asarray(out) - np.asarray(ref))))
    assert np.allclose(np.asarray(out), np.asarray(ref), rtol=2e-2, atol=2e-2), \
        f"max abs diff = {err}"

    print("KERNEL_OK")
</pallas_src>

<mosaic_0001>
module attributes {stable_mosaic.version = 11 : i64} {
  func.func @kernel(%arg0: i32, %arg1: memref<1x16x256xbf16, #tpu.memory_space<vmem>>, %arg2: memref<9x256xf32, #tpu.memory_space<vmem>>, %arg3: memref<8x16xbf16, #tpu.memory_space<vmem>>, %arg4: memref<8x1xf32, #tpu.memory_space<vmem>>, %arg5: memref<8x72xbf16, #tpu.memory_space<vmem>>, %arg6: memref<8x1xf32, #tpu.memory_space<vmem>>, %arg7: memref<8x1xf32, #tpu.memory_space<vmem>>, %arg8: memref<8x72xbf16, #tpu.memory_space<vmem>>, %arg9: memref<8x1xf32, #tpu.memory_space<vmem>>, %arg10: memref<8x1xf32, #tpu.memory_space<vmem>>, %arg11: memref<8x1xf32, #tpu.memory_space<vmem>>, %arg12: memref<1x1xf32, #tpu.memory_space<vmem>>, %arg13: memref<1x1x256xf32, #tpu.memory_space<vmem>>) attributes {dimension_semantics = [#tpu.dimension_semantics<parallel>], iteration_bounds = array<i64: 2>, scalar_prefetch = 0 : i64, scratch_operands = 0 : i64, tpu.core_type = #tpu.core_type<tc>, window_params = [{transform_indices = @transform_0, window_bounds = array<i64: 1, 16, 256>}, {pipeline_mode = #tpu.pipeline_mode<synchronous>, transform_indices = @transform_1, window_bounds = array<i64: 9, 256>}, {pipeline_mode = #tpu.pipeline_mode<synchronous>, transform_indices = @transform_2, window_bounds = array<i64: 8, 16>}, {pipeline_mode = #tpu.pipeline_mode<synchronous>, transform_indices = @transform_3, window_bounds = array<i64: 8, 1>}, {pipeline_mode = #tpu.pipeline_mode<synchronous>, transform_indices = @transform_4, window_bounds = array<i64: 8, 72>}, {pipeline_mode = #tpu.pipeline_mode<synchronous>, transform_indices = @transform_5, window_bounds = array<i64: 8, 1>}, {pipeline_mode = #tpu.pipeline_mode<synchronous>, transform_indices = @transform_6, window_bounds = array<i64: 8, 1>}, {pipeline_mode = #tpu.pipeline_mode<synchronous>, transform_indices = @transform_7, window_bounds = array<i64: 8, 72>}, {pipeline_mode = #tpu.pipeline_mode<synchronous>, transform_indices = @transform_8, window_bounds = array<i64: 8, 1>}, {pipeline_mode = #tpu.pipeline_mode<synchronous>, transform_indices = @transform_9, window_bounds = array<i64: 8, 1>}, {pipeline_mode = #tpu.pipeline_mode<synchronous>, transform_indices = @transform_10, window_bounds = array<i64: 8, 1>}, {pipeline_mode = #tpu.pipeline_mode<synchronous>, transform_indices = @transform_11, window_bounds = array<i64: 1, 1>}, {transform_indices = @transform_12, window_bounds = array<i64: 1, 1, 256>}]} {
    %c0 = arith.constant 0 : index
    %c0_0 = arith.constant 0 : index
    %0 = vector.load %arg2[%c0, %c0_0] : memref<9x256xf32, #tpu.memory_space<vmem>>, vector<1x256xf32>
    %c1 = arith.constant 1 : index
    %c0_1 = arith.constant 0 : index
    %1 = vector.load %arg2[%c1, %c0_1] : memref<9x256xf32, #tpu.memory_space<vmem>>, vector<1x256xf32>
    %c2 = arith.constant 2 : index
    %c0_2 = arith.constant 0 : index
    %2 = vector.load %arg2[%c2, %c0_2] : memref<9x256xf32, #tpu.memory_space<vmem>>, vector<1x256xf32>
    %c3 = arith.constant 3 : index
    %c0_3 = arith.constant 0 : index
    %3 = vector.load %arg2[%c3, %c0_3] : memref<9x256xf32, #tpu.memory_space<vmem>>, vector<1x256xf32>
    %c4 = arith.constant 4 : index
    %c0_4 = arith.constant 0 : index
    %4 = vector.load %arg2[%c4, %c0_4] : memref<9x256xf32, #tpu.memory_space<vmem>>, vector<1x256xf32>
    %c5 = arith.constant 5 : index
    %c0_5 = arith.constant 0 : index
    %5 = vector.load %arg2[%c5, %c0_5] : memref<9x256xf32, #tpu.memory_space<vmem>>, vector<1x256xf32>
    %c6 = arith.constant 6 : index
    %c0_6 = arith.constant 0 : index
    %6 = vector.load %arg2[%c6, %c0_6] : memref<9x256xf32, #tpu.memory_space<vmem>>, vector<1x256xf32>
    %c7 = arith.constant 7 : index
    %c0_7 = arith.constant 0 : index
    %7 = vector.load %arg2[%c7, %c0_7] : memref<9x256xf32, #tpu.memory_space<vmem>>, vector<1x256xf32>
    %c8 = arith.constant 8 : index
    %c0_8 = arith.constant 0 : index
    %8 = vector.load %arg2[%c8, %c0_8] : memref<9x256xf32, #tpu.memory_space<vmem>>, vector<1x256xf32>
    %c0_9 = arith.constant 0 : index
    %c0_10 = arith.constant 0 : index
    %9 = vector.load %arg3[%c0_9, %c0_10] : memref<8x16xbf16, #tpu.memory_space<vmem>>, vector<8x16xbf16>
    %c0_11 = arith.constant 0 : index
    %c0_12 = arith.constant 0 : index
    %10 = vector.load %arg4[%c0_11, %c0_12] : memref<8x1xf32, #tpu.memory_space<vmem>>, vector<8x1xf32>
    %c0_13 = arith.constant 0 : index
    %c0_14 = arith.constant 0 : index
    %11 = vector.load %arg5[%c0_13, %c0_14] : memref<8x72xbf16, #tpu.memory_space<vmem>>, vector<8x72xbf16>
    %c0_15 = arith.constant 0 : index
    %c0_16 = arith.constant 0 : index
    %12 = vector.load %arg6[%c0_15, %c0_16] : memref<8x1xf32, #tpu.memory_space<vmem>>, vector<8x1xf32>
    %c0_17 = arith.constant 0 : index
    %c0_18 = arith.constant 0 : index
    %13 = vector.load %arg7[%c0_17, %c0_18] : memref<8x1xf32, #tpu.memory_space<vmem>>, vector<8x1xf32>
    %c0_19 = arith.constant 0 : index
    %c0_20 = arith.constant 0 : index
    %14 = vector.load %arg8[%c0_19, %c0_20] : memref<8x72xbf16, #tpu.memory_space<vmem>>, vector<8x72xbf16>
    %c0_21 = arith.constant 0 : index
    %c0_22 = arith.constant 0 : index
    %15 = vector.load %arg9[%c0_21, %c0_22] : memref<8x1xf32, #tpu.memory_space<vmem>>, vector<8x1xf32>
    %c0_23 = arith.constant 0 : index
    %c0_24 = arith.constant 0 : index
    %16 = vector.load %arg10[%c0_23, %c0_24] : memref<8x1xf32, #tpu.memory_space<vmem>>, vector<8x1xf32>
    %c0_25 = arith.constant 0 : index
    %c0_26 = arith.constant 0 : index
    %17 = vector.load %arg11[%c0_25, %c0_26] : memref<8x1xf32, #tpu.memory_space<vmem>>, vector<8x1xf32>
    %c0_27 = arith.constant 0 : index
    %c0_28 = arith.constant 0 : index
    %18 = vector.load %arg12[%c0_27, %c0_28] : memref<1x1xf32, #tpu.memory_space<vmem>>, vector<1x1xf32>
    %c0_29 = arith.constant 0 : index
    %c0_30 = arith.constant 0 : index
    %c0_31 = arith.constant 0 : index
    %19 = vector.load %arg1[%c0_29, %c0_30, %c0_31] : memref<1x16x256xbf16, #tpu.memory_space<vmem>>, vector<1x16x256xbf16>
    %20 = vector.shape_cast %19 : vector<1x16x256xbf16> to vector<16x256xbf16>
    %cst = arith.constant dense<0.000000e+00> : vector<8x256xf32>
    %21 = tpu.matmul %9, %20, %cst {dimension_numbers = #tpu.dot_dimension_numbers<[1], [0], [0], [1], [0, 0, 1, 1], [], []>} : vector<8x16xbf16>, vector<16x256xbf16>, vector<8x256xf32> -> vector<8x256xf32>
    %22 = vector.broadcast %10 : vector<8x1xf32> to vector<8x256xf32>
    %23 = arith.addf %21, %22 : vector<8x256xf32>
    %c68_i32 = arith.constant 68 : i32
    %24 = tpu.dynamic_rotate %23 by %c68_i32 dim 1 : vector<8x256xf32>, i32 -> vector<8x256xf32>
    %25 = vector.broadcast %0 : vector<1x256xf32> to vector<8x256xf32>
    %26 = arith.mulf %24, %25 : vector<8x256xf32>
    %c64_i32 = arith.constant 64 : i32
    %27 = tpu.dynamic_rotate %23 by %c64_i32 dim 1 : vector<8x256xf32>, i32 -> vector<8x256xf32>
    %28 = vector.broadcast %1 : vector<1x256xf32> to vector<8x256xf32>
    %29 = arith.mulf %27, %28 : vector<8x256xf32>
    %c60_i32 = arith.constant 60 : i32
    %30 = tpu.dynamic_rotate %23 by %c60_i32 dim 1 : vector<8x256xf32>, i32 -> vector<8x256xf32>
    %31 = vector.broadcast %2 : vector<1x256xf32> to vector<8x256xf32>
    %32 = arith.mulf %30, %31 : vector<8x256xf32>
    %c4_i32 = arith.constant 4 : i32
    %33 = tpu.dynamic_rotate %23 by %c4_i32 dim 1 : vector<8x256xf32>, i32 -> vector<8x256xf32>
    %34 = vector.broadcast %3 : vector<1x256xf32> to vector<8x256xf32>
    %35 = arith.mulf %33, %34 : vector<8x256xf32>
    %36 = vector.broadcast %4 : vector<1x256xf32> to vector<8x256xf32>
    %37 = arith.mulf %23, %36 : vector<8x256xf32>
    %c252_i32 = arith.constant 252 : i32
    %38 = tpu.dynamic_rotate %23 by %c252_i32 dim 1 : vector<8x256xf32>, i32 -> vector<8x256xf32>
    %39 = vector.broadcast %5 : vector<1x256xf32> to vector<8x256xf32>
    %40 = arith.mulf %38, %39 : vector<8x256xf32>
    %c196_i32 = arith.constant 196 : i32
    %41 = tpu.dynamic_rotate %23 by %c196_i32 dim 1 : vector<8x256xf32>, i32 -> vector<8x256xf32>
    %42 = vector.broadcast %6 : vector<1x256xf32> to vector<8x256xf32>
    %43 = arith.mulf %41, %42 : vector<8x256xf32>
    %c192_i32 = arith.constant 192 : i32
    %44 = tpu.dynamic_rotate %23 by %c192_i32 dim 1 : vector<8x256xf32>, i32 -> vector<8x256xf32>
    %45 = vector.broadcast %7 : vector<1x256xf32> to vector<8x256xf32>
    %46 = arith.mulf %44, %45 : vector<8x256xf32>
    %c188_i32 = arith.constant 188 : i32
    %47 = tpu.dynamic_rotate %23 by %c188_i32 dim 1 : vector<8x256xf32>, i32 -> vector<8x256xf32>
    %48 = vector.broadcast %8 : vector<1x256xf32> to vector<8x256xf32>
    %49 = arith.mulf %47, %48 : vector<8x256xf32>
    %50 = tpu.concatenate %26, %29, %32, %35, %37, %40, %43, %46, %49 in 0 : vector<8x256xf32>, vector<8x256xf32>, vector<8x256xf32>, vector<8x256xf32>, vector<8x256xf32>, vector<8x256xf32>, vector<8x256xf32>, vector<8x256xf32>, vector<8x256xf32> -> vector<72x256xf32>
    %51 = arith.truncf %50 : vector<72x256xf32> to vector<72x256xbf16>
    %cst_32 = arith.constant dense<0.000000e+00> : vector<8x256xf32>
    %52 = tpu.matmul %11, %51, %cst_32 {dimension_numbers = #tpu.dot_dimension_numbers<[1], [0], [0], [1], [0, 0, 1, 1], [], []>} : vector<8x72xbf16>, vector<72x256xbf16>, vector<8x256xf32> -> vector<8x256xf32>
    %53 = vector.broadcast %12 : vector<8x1xf32> to vector<8x256xf32>
    %54 = arith.mulf %52, %53 : vector<8x256xf32>
    %55 = vector.broadcast %13 : vector<8x1xf32> to vector<8x256xf32>
    %56 = arith.addf %54, %55 : vector<8x256xf32>
    %cst_33 = arith.constant 0.000000e+00 : f32
    %57 = vector.broadcast %cst_33 : f32 to vector<8x256xf32>
    %58 = arith.maximumf %56, %57 : vector<8x256xf32>
    %c68_i32_34 = arith.constant 68 : i32
    %59 = tpu.dynamic_rotate %58 by %c68_i32_34 dim 1 : vector<8x256xf32>, i32 -> vector<8x256xf32>
    %60 = vector.broadcast %0 : vector<1x256xf32> to vector<8x256xf32>
    %61 = arith.mulf %59, %60 : vector<8x256xf32>
    %c64_i32_35 = arith.constant 64 : i32
    %62 = tpu.dynamic_rotate %58 by %c64_i32_35 dim 1 : vector<8x256xf32>, i32 -> vector<8x256xf32>
    %63 = vector.broadcast %1 : vector<1x256xf32> to vector<8x256xf32>
    %64 = arith.mulf %62, %63 : vector<8x256xf32>
    %c60_i32_36 = arith.constant 60 : i32
    %65 = tpu.dynamic_rotate %58 by %c60_i32_36 dim 1 : vector<8x256xf32>, i32 -> vector<8x256xf32>
    %66 = vector.broadcast %2 : vector<1x256xf32> to vector<8x256xf32>
    %67 = arith.mulf %65, %66 : vector<8x256xf32>
    %c4_i32_37 = arith.constant 4 : i32
    %68 = tpu.dynamic_rotate %58 by %c4_i32_37 dim 1 : vector<8x256xf32>, i32 -> vector<8x256xf32>
    %69 = vector.broadcast %3 : vector<1x256xf32> to vector<8x256xf32>
    %70 = arith.mulf %68, %69 : vector<8x256xf32>
    %71 = vector.broadcast %4 : vector<1x256xf32> to vector<8x256xf32>
    %72 = arith.mulf %58, %71 : vector<8x256xf32>
    %c252_i32_38 = arith.constant 252 : i32
    %73 = tpu.dynamic_rotate %58 by %c252_i32_38 dim 1 : vector<8x256xf32>, i32 -> vector<8x256xf32>
    %74 = vector.broadcast %5 : vector<1x256xf32> to vector<8x256xf32>
    %75 = arith.mulf %73, %74 : vector<8x256xf32>
    %c196_i32_39 = arith.constant 196 : i32
    %76 = tpu.dynamic_rotate %58 by %c196_i32_39 dim 1 : vector<8x256xf32>, i32 -> vector<8x256xf32>
    %77 = vector.broadcast %6 : vector<1x256xf32> to vector<8x256xf32>
    %78 = arith.mulf %76, %77 : vector<8x256xf32>
    %c192_i32_40 = arith.constant 192 : i32
    %79 = tpu.dynamic_rotate %58 by %c192_i32_40 dim 1 : vector<8x256xf32>, i32 -> vector<8x256xf32>
    %80 = vector.broadcast %7 : vector<1x256xf32> to vector<8x256xf32>
    %81 = arith.mulf %79, %80 : vector<8x256xf32>
    %c188_i32_41 = arith.constant 188 : i32
    %82 = tpu.dynamic_rotate %58 by %c188_i32_41 dim 1 : vector<8x256xf32>, i32 -> vector<8x256xf32>
    %83 = vector.broadcast %8 : vector<1x256xf32> to vector<8x256xf32>
    %84 = arith.mulf %82, %83 : vector<8x256xf32>
    %85 = tpu.concatenate %61, %64, %67, %70, %72, %75, %78, %81, %84 in 0 : vector<8x256xf32>, vector<8x256xf32>, vector<8x256xf32>, vector<8x256xf32>, vector<8x256xf32>, vector<8x256xf32>, vector<8x256xf32>, vector<8x256xf32>, vector<8x256xf32> -> vector<72x256xf32>
    %86 = arith.truncf %85 : vector<72x256xf32> to vector<72x256xbf16>
    %cst_42 = arith.constant dense<0.000000e+00> : vector<8x256xf32>
    %87 = tpu.matmul %14, %86, %cst_42 {dimension_numbers = #tpu.dot_dimension_numbers<[1], [0], [0], [1], [0, 0, 1, 1], [], []>} : vector<8x72xbf16>, vector<72x256xbf16>, vector<8x256xf32> -> vector<8x256xf32>
    %88 = vector.broadcast %15 : vector<8x1xf32> to vector<8x256xf32>
    %89 = arith.mulf %87, %88 : vector<8x256xf32>
    %90 = vector.broadcast %16 : vector<8x1xf32> to vector<8x256xf32>
    %91 = arith.addf %89, %90 : vector<8x256xf32>
    %cst_43 = arith.constant 0.000000e+00 : f32
    %92 = vector.broadcast %cst_43 : f32 to vector<8x256xf32>
    %93 = arith.maximumf %91, %92 : vector<8x256xf32>
    %94 = vector.broadcast %17 : vector<8x1xf32> to vector<8x256xf32>
    %95 = arith.mulf %93, %94 : vector<8x256xf32>
    %cst_44 = arith.constant dense<0.000000e+00> : vector<256xf32>
    %96 = vector.multi_reduction <add>, %95, %cst_44 [0] : vector<8x256xf32> to vector<256xf32>
    %97 = vector.shape_cast %96 : vector<256xf32> to vector<1x256xf32>
    %98 = vector.broadcast %18 : vector<1x1xf32> to vector<1x256xf32>
    %99 = arith.addf %97, %98 : vector<1x256xf32>
    %c0_45 = arith.constant 0 : index
    %c0_46 = arith.constant 0 : index
    %c0_47 = arith.constant 0 : index
    %100 = vector.load %arg13[%c0_45, %c0_46, %c0_47] : memref<1x1x256xf32, #tpu.memory_space<vmem>>, vector<1x1x256xf32>
    %101 = vector.shape_cast %100 : vector<1x1x256xf32> to vector<1x256xf32>
    %102 = vector.shape_cast %99 : vector<1x256xf32> to vector<1x1x256xf32>
    tpu.vector_store %arg13[%c0_45, %c0_46, %c0_47], %102 {strides = array<i32>} : memref<1x1x256xf32, #tpu.memory_space<vmem>>, vector<1x1x256xf32>,
    return
  }
  func.func @transform_0(%arg0: i32) -> (i32, i32, i32) {
    %c0_i32 = arith.constant 0 : i32
    %c0_i32_0 = arith.constant 0 : i32
    %c0_i32_1 = arith.constant 0 : i32
    return %arg0, %c0_i32, %c0_i32_0 : i32, i32, i32
  }
  func.func @transform_1(%arg0: i32) -> (i32, i32) {
    %c0_i32 = arith.constant 0 : i32
    %c0_i32_0 = arith.constant 0 : i32
    %c0_i32_1 = arith.constant 0 : i32
    return %c0_i32, %c0_i32_0 : i32, i32
  }
  func.func @transform_2(%arg0: i32) -> (i32, i32) {
    %c0_i32 = arith.constant 0 : i32
    %c0_i32_0 = arith.constant 0 : i32
    %c0_i32_1 = arith.constant 0 : i32
    return %c0_i32, %c0_i32_0 : i32, i32
  }
  func.func @transform_3(%arg0: i32) -> (i32, i32) {
    %c0_i32 = arith.constant 0 : i32
    %c0_i32_0 = arith.constant 0 : i32
    %c0_i32_1 = arith.constant 0 : i32
    return %c0_i32, %c0_i32_0 : i32, i32
  }
  func.func @transform_4(%arg0: i32) -> (i32, i32) {
    %c0_i32 = arith.constant 0 : i32
    %c0_i32_0 = arith.constant 0 : i32
    %c0_i32_1 = arith.constant 0 : i32
    return %c0_i32, %c0_i32_0 : i32, i32
  }
  func.func @transform_5(%arg0: i32) -> (i32, i32) {
    %c0_i32 = arith.constant 0 : i32
    %c0_i32_0 = arith.constant 0 : i32
    %c0_i32_1 = arith.constant 0 : i32
    return %c0_i32, %c0_i32_0 : i32, i32
  }
  func.func @transform_6(%arg0: i32) -> (i32, i32) {
    %c0_i32 = arith.constant 0 : i32
    %c0_i32_0 = arith.constant 0 : i32
    %c0_i32_1 = arith.constant 0 : i32
    return %c0_i32, %c0_i32_0 : i32, i32
  }
  func.func @transform_7(%arg0: i32) -> (i32, i32) {
    %c0_i32 = arith.constant 0 : i32
    %c0_i32_0 = arith.constant 0 : i32
    %c0_i32_1 = arith.constant 0 : i32
    return %c0_i32, %c0_i32_0 : i32, i32
  }
  func.func @transform_8(%arg0: i32) -> (i32, i32) {
    %c0_i32 = arith.constant 0 : i32
    %c0_i32_0 = arith.constant 0 : i32
    %c0_i32_1 = arith.constant 0 : i32
    return %c0_i32, %c0_i32_0 : i32, i32
  }
  func.func @transform_9(%arg0: i32) -> (i32, i32) {
    %c0_i32 = arith.constant 0 : i32
    %c0_i32_0 = arith.constant 0 : i32
    %c0_i32_1 = arith.constant 0 : i32
    return %c0_i32, %c0_i32_0 : i32, i32
  }
  func.func @transform_10(%arg0: i32) -> (i32, i32) {
    %c0_i32 = arith.constant 0 : i32
    %c0_i32_0 = arith.constant 0 : i32
    %c0_i32_1 = arith.constant 0 : i32
    return %c0_i32, %c0_i32_0 : i32, i32
  }
  func.func @transform_11(%arg0: i32) -> (i32, i32) {
    %c0_i32 = arith.constant 0 : i32
    %c0_i32_0 = arith.constant 0 : i32
    %c0_i32_1 = arith.constant 0 : i32
    return %c0_i32, %c0_i32_0 : i32, i32
  }
  func.func @transform_12(%arg0: i32) -> (i32, i32, i32) {
    %c0_i32 = arith.constant 0 : i32
    %c0_i32_0 = arith.constant 0 : i32
    %c0_i32_1 = arith.constant 0 : i32
    return %arg0, %c0_i32, %c0_i32_0 : i32, i32, i32
  }
}

</mosaic_0001>

<bundles_post_ra>
// kernel: tpu_custom_call.1
= control target key start
LH: loop header
LB: loop body
LE: loop exit
PB: predicated region body
PF: predicated region fallthrough
CT: control target
= control target key end

     0   :  { %s1600_s0 = inlined_call_operand.vmem [shape: bf16[2,16,256], index: 0, kind: input, shape index: {}]   ;;  %s1601_s1 = inlined_call_operand.hbm [shape: f32[9,256], index: 1, kind: input, shape index: {}]   ;;  %s1602_s2 = inlined_call_operand.vmem [shape: bf16[8,16], index: 2, kind: input, shape index: {}]   ;;  %s1603_s3 = inlined_call_operand.vmem [shape: f32[8,1], index: 3, kind: input, shape index: {}]   ;;  %s1604_s4 = inlined_call_operand.vmem [shape: bf16[8,72], index: 4, kind: input, shape index: {}]   ;;  %s1605_s5 = inlined_call_operand.vmem [shape: f32[8,1], index: 5, kind: input, shape index: {}]   ;;  %s1606_s6 = inlined_call_operand.vmem [shape: f32[8,1], index: 6, kind: input, shape index: {}]   ;;  %s1607_s7 = inlined_call_operand.vmem [shape: bf16[8,72], index: 7, kind: input, shape index: {}]   ;;  %s1608_s8 = inlined_call_operand.vmem [shape: f32[8,1], index: 8, kind: input, shape index: {}]   ;;  %s1609_s9 = inlined_call_operand.vmem [shape: f32[8,1], index: 9, kind: input, shape index: {}]   ;;  %s1610_s10 = inlined_call_operand.vmem [shape: f32[8,1], index: 10, kind: input, shape index: {}]   ;;  %s1611_s11 = inlined_call_operand.<no memory space> [shape: f32[1,1], index: 11, kind: input, shape index: {}]   ;;  %s1612_s12 = inlined_call_operand.hbm [shape: f32[2,1,256], index: 12, kind: output, shape index: {}]  }
   0x1   :  { %1613 = sst [smem:[#allocation9_spill]] %s1600_s0  ;;  %v17_v0 = vstv %s1611_s11 }
   0x2   :  { %1614 = sst [smem:[#allocation10_spill]] %s1601_s1  ;;  %18 = vst [vmem:[#allocation2] sm:$0x1] %v17_v0 }
   0x3   :  { %19 = vsyncpa [#allocation4], 0 }
   0x4   :  { %20 = vsyncpa [#allocation5], 0 }
   0x5   :  { %22 = vsyncpa [#allocation5 + $0x1], 0  ;;  %s1272_s23 = smov 0   ;;  %s1274_s24 = smov 0  }
   0x6   :  { %s1276_s25 = smov 0   ;;  %s1278_s26 = smov 0  }
   0x7 LB: > { %s1293_s11 = sadd.s32 4294967295, %s1191_s26   ;;  %s1014_s27 = sadd.s32 4294967294, %s1191_s26   ;;  %s1191_s26 = sphi %s1278_s26, %s1624_s26   ;;  %s1187_s25 = sphi %s1276_s25, %s1623_s25   ;;  %s1183_s24 = sphi %s1274_s24, %s1622_s24   ;;  %s1179_s23 = sphi %s1272_s23, %s1621_s23  }
   0x8   : > { %s1297_s28 = sadd.s32 1, %s1191_s26   ;;  %s292_s29 = sadd.s32 1, %s1187_s25 }
   0x9   : > { %s289_s30 = ssub.s32 %s1191_s26, %s1297_s28  ;;  %p302_p0 = scmp.ne.s32.totalorder %s1187_s25, %s1183_s24 }
   0xa   : > { %p290_p1 = scmp.eq.s32.totalorder %s289_s30, 0  ;;  %p303_p2 = scmp.eq.s32.totalorder %s1293_s11, 1 }
   0xb   : > { %p308_p3 = scmp.ne.s32.totalorder %s1183_s24, %s1179_s23  ;;  %p309_p4 = scmp.eq.s32.totalorder %s1014_s27, 1 }
   0xc   : > { %s1308_s13 = scalar_select %p290_p1, %s1187_s25, %s292_s29  }
   0xd   : > { %p1310_p5 = por %p303_p2, %p302_p0  ;;  %p1314_p6 = por %p309_p4, %p308_p3 }
   0xe   : > { %p1015_p7 = scmp.ge.s32.totalorder %s1191_s26, 1  ;;  %p316_p8 = scmp.lt.s32.totalorder %s1191_s26, 3 }
   0xf   : > { %s1616_s15 = scalar_select %p1314_p6, 1, 0 }
  0x10   : > { %p1051_p9 = scmp.eq.s32.totalorder %s1293_s11, 0  ;;  %p1321_p10 = pnand %p1015_p7, %p316_p8 }
  0x11   : > { %s1193_s17 = smov [#allocation3]  }
  0x12   : > { %s328_s18 = sshll.u32 %s1193_s17, 4  ;;  %p1043_p11 = pneg %p1321_p10  ;;  %s329_s18 = int_to_ptr.vmem [resolvable:$true] %s328_s18 }
  0x13   : > { %s1112_s19 = scalar_lea.vmem %s329_s18, 512  ;;  %p1120_p3 = scmp.lt.s32.totalorder %s329_s18, %s329_s18 }
  0x14   : > { %p1044_p12 = pnand %p1051_p9, %p1043_p11  ;;  %p1113_p0 = scmp.ne.s32.totalorder %s329_s18, %s1112_s19 }
  0x15   : > { %p1121_p4 = scmp.lt.s32.totalorder %s1112_s19, %s1112_s19 }
  0x16   : > { %p1103_p13 = pneg %p1044_p12 }
  0x17   : > { %p1122_p6 = por %p1121_p4, %p1120_p3 }
  0x18   : > { %p1115_p1 = pnand %p1113_p0, %p1103_p13 }
  0x1a   : > { %p1116_p2 = pneg %p1115_p1 }
  0x1c   : > { %p1123_p7 = pnand %p1122_p6, %p1116_p2 }
  0x1e   : > { %1126 = shalt.err (!%p1123_p7)
}
  0x1f   : > { %s1194_s20 = smov 256   ;;  %s1195_s21 = smov 16  }
  0x20   : > { %s1618_s1 = sld [smem:[#allocation10_spill]] }
  0x22   : > { %382 = sbr.rel (%p1321_p10) target bundleno = 972 (0x3cc), region = 68 }
  0x26   : > { %1046 = dma.hbm_to_vmem [thread:$0]  (!%p1044_p12), %s1618_s1, 512, %s329_s18, [#allocation4], %s1194_s20, %s1194_s20, %s1195_s21  }
  0x27   : > { %1170 = dma.done.wait (%p1051_p9), [#allocation4], 512  }
  0x28   : > { %1172 = vsyncadd (%p1051_p9), [#allocation4], 4294966784  ;;  %p424_p8 = scmp.lt.s32.totalorder %s1293_s11, 1  ;;  %v1196_v1 = vmov 0   ;;  %s1619_s0 = sld [smem:[#allocation9_spill]]  ;;  %v448_v4 = vld [vmem:[%s1603_s3] sm:$0xff]  ;;  %v523_v15 = vlaneseq }
  0x29   : > { %510 = vmatprep.mubr.bf16.mxu0 %v1196_v1  ;;  %1096 = vset.pattern.permute.xlu0 %v1196_v1  ;;  %v447_v5 = vld [vmem:[%s1602_s2] sm:$0xf]  ;;  %vm474_vm0 = vcmask 130048   ;;  %s1197_s27 = smov 68   ;;  %s1200_s17 = smov 124   ;;  %vm687_vm4 = vcmask 1043456  }
  0x2a   : > { %s425_s29 = scalar_select %p424_p8, %s1293_s11, 1  ;;  %726 = vmatprep.mubr.bf16.mxu1 %v1196_v1  ;;  %1097 = vset.pattern.permute.xlu1 %v1196_v1  ;;  %v451_v13 = vld [vmem:[%s1606_s6] sm:$0xff]  ;;  %v1380_v16 = vshrl.u32 %v523_v15, 7  ;;  %v1383_v17 = vand.u32 127, %v523_v15  ;;  %vm683_vm7 = vcmask 588800   ;;  %vm925_vm8 = vcmp.lt.s32.totalorder %v523_v15, 256 }
  0x2b   : > { %461 = vperm.xlu0 %1096, %v448_v4   ;;  %s1201_s18 = smov 4   ;;  %v450_v14 = vld [vmem:[%s1605_s5] sm:$0xff]  ;;  %v446_v18 = vld [vmem:[#allocation3 + $0x10] ss:$8 sm:$0x3]  ;;  %s1036_s19 = sshll.u32 %s1293_s11, 5 }
  0x2c   : > { %s1035_s30 = sshll.u32 %s425_s29, 4  ;;  %s1198_s29 = smov 60   ;;  %v1386_v21 = vsub.s32 0, %v1380_v16  ;;  %v1389_v22 = vsub.s32 1, %v1380_v16  ;;  %vm565_vm1 = vcmp.lt.s32.totalorder %v1383_v17, 60  ;;  %vm525_vm2 = vcmp.lt.s32.totalorder %v1383_v17, 68 }
  0x2d   : > { %v438_v23 = vld [vmem:[#allocation3 + $0x4] ss:$8 sm:$0x3]  ;;  %v442_v25 = vld [vmem:[#allocation3 + $0x6] ss:$8 sm:$0x3]  ;;  %s941_s22 = scalar_lea.hbm %s1612_s12, %s1036_s19 }
  0x2e   : > { %s428_s16 = scalar_lea.vmem %s1619_s0, %s1035_s30  ;;  %s1199_s30 = smov 64   ;;  %v1393_v24 = vrot.slane %v446_v18, %v1386_v21  ;;  %v444_v26 = vld [vmem:[#allocation3 + $0x7] ss:$8 sm:$0x3]  ;;  %v1396_v27 = vrot.slane %v446_v18, %v1389_v22  ;;  %v1400_v30 = vrot.slane %v438_v23, %v1386_v21  ;;  %v1407_v33 = vrot.slane %v442_v25, %v1386_v21 }
  0x2f   : > { %v1098_v2 = vld [vmem:[%s428_s16 + $0x4] ss:$8 sps:$4 sm:$0xff]   ;;  %v1100_v3 = vld [vmem:[%s428_s16] ss:$8 sps:$4 sm:$0xff]   ;;  %v1410_v34 = vrot.slane %v442_v25, %v1389_v22  ;;  %vm545_vm3 = vcmp.lt.s32.totalorder %v1383_v17, 64  ;;  %v1415_v37 = vrot.slane %v444_v26, %v1386_v21  ;;  %v1418_v38 = vrot.slane %v444_v26, %v1389_v22  ;;  %s1203_s0 = smov [#allocation6]  }
  0x30   : > { %492 = vmatprep.subr.bf16.mxu0 %v1098_v2  ;;  %v440_v35 = vld [vmem:[#allocation3 + $0x5] ss:$8 sm:$0x3]  ;;  %v1428_v42 = vrot.slane %v438_v23, %v1389_v22  ;;  %v434_v43 = vld [vmem:[#allocation3 + $0x2] ss:$8 sm:$0x3] }
  0x31   : > { %493 = vmatpush1.bf16.msra.mxu0 %v1100_v3  ;;  %vm618_vm5 = vcmp.lt.s32.totalorder %v1383_v17, 124  ;;  %v1432_v47 = vrot.slane %v440_v35, %v1386_v21  ;;  %v1439_v51 = vrot.slane %v440_v35, %v1389_v22  ;;  %v1447_v56 = vrot.slane %v434_v43, %v1386_v21  ;;  %v436_v58 = vld [vmem:[#allocation3 + $0x3] ss:$8 sm:$0x3]  ;;  %s1131_s11 = sshll.u32 %s1203_s0, 4  ;;  %s1132_s11 = int_to_ptr.vmem [resolvable:$false] %s1131_s11 }
  0x32   : > { %v1452_v59 = vrot.slane %v434_v43, %v1389_v22  ;;  %v432_v60 = vld [vmem:[#allocation3 + $0x1] ss:$8 sm:$0x3]  ;;  %vm585_vm6 = vcmp.lt.s32.totalorder %v1383_v17, 4 }
  0x34   : > { %1025 = vmatmul.mubr.msk.bf16.vlgmr.msra.gmra.mxu0 %vm474_vm0, %v447_v5  ;;  %v430_v5 = vld [vmem:[#allocation3] ss:$8 sm:$0x3] }
  0x35   : > { %850 = vmatprep.mubr.bf16.mxu0 %v1196_v1  ;;  %v1475_v18 = vrot.slane %v430_v5, %v1389_v22  ;;  %v1490_v35 = vrot.slane %v430_v5, %v1386_v21 }
  0xa6   : > { %v462_v6 = vpop.permute.xlu0 %461 }
  0xf4   : > { %v512_v7 = vpop.f32.mrf.mxu0 }
  0xf5   : > { %v1349_v8 = vadd.f32 %v512_v7, %v462_v6 }
  0xf6   : > { %v514_v9 = vpop.f32.mrf.mxu0 }
  0xf7   : > { %519 = vrot.lane.b32.xlu1 %v1349_v8, %s1197_s27  ;;  %561 = vrot.lane.b32.xlu0 %v1349_v8, %s1198_s29  ;;  %v1355_v11 = vadd.f32 %v514_v9, %v462_v6  ;;  %v612_v1 = vmul.f32 %v1400_v30, %v1349_v8  ;;  %v1466_v9 = vrot.slane %v436_v58, %v1386_v21 }
  0xf8   : > { %v516_v10 = vpop.f32.mrf.mxu0 }
  0xf9   : > { %v613_v4 = vmul.f32 %v1428_v42, %v1355_v11  ;;  %v1472_v10 = vrot.slane %v432_v60, %v1389_v22 }
  0xfa   : > { %v517_v12 = vpop.f32.mrf.mxu0 }
  0xfb   : > { %563 = vrot.lane.b32.xlu1 %v1355_v11, %s1198_s29  ;;  %521 = vrot.lane.b32.xlu0 %v1355_v11, %s1197_s27 }
  0xff   : > { %541 = vrot.lane.b32.xlu1 %v1349_v8, %s1199_s30  ;;  %543 = vrot.lane.b32.xlu0 %v1355_v11, %s1199_s30 }
 0x103   : > { %614 = vrot.lane.b32.xlu1 %v1349_v8, %s1200_s17  ;;  %616 = vrot.lane.b32.xlu0 %v1355_v11, %s1200_s17 }
 0x107   : > { %581 = vrot.lane.b32.xlu1 %v1349_v8, %s1201_s18  ;;  %583 = vrot.lane.b32.xlu0 %v1355_v11, %s1201_s18  ;;  %v1469_v8 = vrot.slane %v436_v58, %v1389_v22 }
 0x10b   : > { %744 = vperm.xlu0 %1096, %v451_v13   ;;  %737 = vperm.xlu1 %1097, %v450_v14  }
 0x169   : > { %v520_v19 = vpop.permute.xlu1 %519  ;;  %v562_v20 = vpop.permute.xlu0 %561 }
 0x16d   : > { %v564_v28 = vpop.permute.xlu1 %563  ;;  %v522_v29 = vpop.permute.xlu0 %521 }
 0x16e   : > { %v566_v31 = vsel %vm565_vm1, %v562_v20, %v564_v28  ;;  %v567_v32 = vsel %vm565_vm1, %v564_v28, %v562_v20  ;;  %v526_v39 = vsel %vm525_vm2, %v520_v19, %v522_v29  ;;  %v1424_v40 = vsel %vm525_vm2, %v522_v29, %v520_v19 }
 0x16f   : > { %v671_v36 = vmul.f32 %v1393_v24, %v566_v31  ;;  %v672_v41 = vmul.f32 %v1396_v27, %v567_v32  ;;  %v645_v52 = vmul.f32 %v1407_v33, %v526_v39  ;;  %v646_v53 = vmul.f32 %v1410_v34, %v1424_v40 }
 0x170   : > { %v1478_v19 = vrot.slane %v432_v60, %v1386_v21  ;;  %v579_v25 = vmul.f32 %v1447_v56, %v567_v32  ;;  %v580_v26 = vmul.f32 %v1452_v59, %v566_v31  ;;  %v540_v43 = vmul.f32 %v1475_v18, %v526_v39 }
 0x171   : > { %v542_v44 = vpop.permute.xlu1 %541  ;;  %v544_v45 = vpop.permute.xlu0 %543  ;;  %v681_v46 = vpack.c.bf16 %v671_v36, %v671_v36  ;;  %v682_v50 = vpack.c.bf16 %v672_v41, %v672_v41  ;;  %v539_v31 = vmul.f32 %v1490_v35, %v1424_v40 }
 0x172   : > { %v546_v48 = vsel %vm545_vm3, %v542_v44, %v544_v45  ;;  %v547_v49 = vsel %vm545_vm3, %v544_v45, %v542_v44 }
 0x173   : > { %v658_v54 = vmul.f32 %v1415_v37, %v546_v48  ;;  %v659_v55 = vmul.f32 %v1418_v38, %v547_v49  ;;  %1026 = vmatprep.subr.msk.bf16.mxu1 %vm687_vm4, %v682_v50  ;;  %v689_v57 = vsel %vm687_vm4, %v681_v46, 0  ;;  %v560_v22 = vmul.f32 %v1472_v10, %v546_v48  ;;  %v449_v46 = vld [vmem:[%s1604_s4] sm:$0xf] }
 0x174   : > { %701 = vmatpush1.bf16.msra.mxu1 %v689_v57  ;;  %v559_v44 = vmul.f32 %v1478_v19, %v547_v49 }
 0x175   : > { %v615_v61 = vpop.permute.xlu1 %614  ;;  %v617_v62 = vpop.permute.xlu0 %616  ;;  %v680_v63 = vpack.c.bf16 %v659_v55, %v646_v53  ;;  %v679_v0 = vpack.c.bf16 %v658_v54, %v645_v52  ;;  %v674_v32 = vpack.c.bf16 %v560_v22, %v540_v43 }
 0x176   : > { %v619_v2 = vsel %vm618_vm5, %v615_v61, %v617_v62  ;;  %v620_v3 = vsel %vm618_vm5, %v617_v62, %v615_v61  ;;  %v673_v45 = vpack.c.bf16 %v559_v44, %v539_v31  ;;  %v453_v61 = vld [vmem:[%s1608_s8] sm:$0xff] }
 0x177   : > { %v632_v6 = vmul.f32 %v1432_v47, %v619_v2  ;;  %v633_v7 = vmul.f32 %v1439_v51, %v620_v3  ;;  %702 = vmatprep.subr.bf16.mxu1 %v680_v63  ;;  %v454_v62 = vld [vmem:[%s1609_s9] sm:$0xff] }
 0x178   : > { %703 = vmatpush1.bf16.msra.mxu1 %v679_v0  ;;  %v455_v63 = vld [vmem:[%s1610_s10] sm:$0xff] }
 0x179   : > { %v582_v12 = vpop.permute.xlu1 %581  ;;  %v584_v13 = vpop.permute.xlu0 %583  ;;  %v678_v14 = vpack.c.bf16 %v633_v7, %v613_v4  ;;  %v677_v11 = vpack.c.bf16 %v632_v6, %v612_v1  ;;  %v456_v0 = vld [vmem:[#allocation2] sm:$0x1] }
 0x17a   : > { %v586_v20 = vsel %vm585_vm6, %v582_v12, %v584_v13  ;;  %v587_v23 = vsel %vm585_vm6, %v584_v13, %v582_v12 }
 0x17b   : > { %v599_v28 = vmul.f32 %v1466_v9, %v587_v23  ;;  %v600_v29 = vmul.f32 %v1469_v8, %v586_v20  ;;  %704 = vmatprep.subr.bf16.mxu1 %v678_v14 }
 0x17c   : > { %705 = vmatpush1.bf16.msra.mxu1 %v677_v11 }
 0x17d   : > { %v676_v36 = vpack.c.bf16 %v600_v29, %v580_v26  ;;  %v675_v41 = vpack.c.bf16 %v599_v28, %v579_v25 }
 0x17f   : > { %706 = vmatprep.subr.bf16.mxu1 %v676_v36 }
 0x180   : > { %707 = vmatpush1.bf16.msra.mxu1 %v675_v41 }
 0x181   : > { %708 = vmatprep.subr.bf16.mxu1 %v674_v32 }
 0x184   : > { %709 = vmatpush1.bf16.msra.mxu1 %v673_v45 }
 0x186   : > { %v738_v48 = vpop.permute.xlu1 %737  ;;  %v745_v49 = vpop.permute.xlu0 %744 }
 0x187   : > { %1027 = vmatmul.mubr.msk.bf16.vlgmr.msra.gmra.mxu1 %vm683_vm7, %v449_v46 }
 0x247   : > { %v728_v39 = vpop.f32.mrf.mxu1 }
 0x248   : > { %v740_v50 = vmul.f32 %v738_v48, %v728_v39 }
 0x249   : > { %v730_v52 = vpop.f32.mrf.mxu1 }
 0x24a   : > { %v747_v53 = vadd.f32 %v745_v49, %v740_v50  ;;  %v741_v54 = vmul.f32 %v738_v48, %v730_v52 }
 0x24b   : > { %v732_v55 = vpop.f32.mrf.mxu1 }
 0x24c   : > { %v749_v40 = vmax.f32 %v747_v53, 0.0  ;;  %v748_v57 = vadd.f32 %v745_v49, %v741_v54 }
 0x24d   : > { %v733_v58 = vpop.f32.mrf.mxu1 }
 0x24e   : > { %v750_v60 = vmax.f32 %v748_v57, 0.0  ;;  %767 = vrot.lane.b32.xlu1 %v749_v40, %s1198_s29  ;;  %v783_v46 = vmul.f32 %v749_v40, %v1400_v30 }
 0x250   : > { %769 = vrot.lane.b32.xlu0 %v750_v60, %s1198_s29 }
 0x252   : > { %751 = vrot.lane.b32.xlu1 %v749_v40, %s1197_s27 }
 0x254   : > { %753 = vrot.lane.b32.xlu0 %v750_v60, %s1197_s27 }
 0x256   : > { %759 = vrot.lane.b32.xlu1 %v749_v40, %s1199_s30 }
 0x258   : > { %761 = vrot.lane.b32.xlu0 %v750_v60, %s1199_s30 }
 0x25a   : > { %785 = vrot.lane.b32.xlu1 %v749_v40, %s1200_s17 }
 0x25c   : > { %787 = vrot.lane.b32.xlu0 %v750_v60, %s1200_s17 }
 0x25e   : > { %775 = vrot.lane.b32.xlu1 %v749_v40, %s1201_s18 }
 0x260   : > { %777 = vrot.lane.b32.xlu0 %v750_v60, %s1201_s18  ;;  %s421_s18 = sand.u32 1, %s1183_s24  }
 0x261   : > { %s1020_s16 = sshll.u32 %s421_s18, 1  ;;  %s929_s30 = scalar_lea.sflag [#allocation5], %s421_s18 }
 0x262   : > { %861 = vperm.xlu1 %1097, %v453_v61   ;;  %s423_s20 = scalar_lea.vmem [#allocation6], %s1020_s16  ;;  %s1133_s16 = scalar_lea.vmem %s1132_s11, 64 }
 0x263   : > { %s943_s29 = sshll.u32 %s423_s20, 4  ;;  %s944_s29 = int_to_ptr.vmem [resolvable:$true] %s943_s29 }
 0x264   : > { %868 = vperm.xlu0 %1096, %v454_v62   ;;  %s1127_s17 = scalar_lea.vmem %s944_s29, 32  ;;  %p1134_p11 = scmp.lt.s32.totalorder %s944_s29, %s1132_s11 }
 0x265   : > { %p1128_p6 = scmp.ne.s32.totalorder %s944_s29, %s1127_s17  ;;  %p1135_p12 = scmp.lt.s32.totalorder %s1133_s16, %s1127_s17 }
 0x266   : > { %877 = vperm.xlu1 %1097, %v455_v63  }
 0x267   : > { %p1129_p9 = pnand %p1128_p6, %p1310_p5  ;;  %p1136_p13 = por %p1135_p12, %p1134_p11 }
 0x268   : > { %896 = vperm.xlu0 %1096, %v456_v0  }
 0x269   : > { %p1130_p10 = pneg %p1129_p9 }
 0x26b   : > { %p1137_p0 = pnand %p1136_p13, %p1130_p10 }
 0x2c0   : > { %v768_v1 = vpop.permute.xlu1 %767 }
 0x2c2   : > { %v770_v2 = vpop.permute.xlu0 %769 }
 0x2c3   : > { %v771_v3 = vsel %vm565_vm1, %v768_v1, %v770_v2  ;;  %v772_v4 = vsel %vm565_vm1, %v770_v2, %v768_v1 }
 0x2c4   : > { %v797_v5 = vmul.f32 %v771_v3, %v1393_v24  ;;  %v798_v6 = vmul.f32 %v772_v4, %v1396_v27  ;;  %v752_v7 = vpop.permute.xlu1 %751  ;;  %v773_v49 = vmul.f32 %v772_v4, %v1447_v56 }
 0x2c6   : > { %v807_v12 = vpack.c.bf16 %v797_v5, %v797_v5  ;;  %v808_v13 = vpack.c.bf16 %v798_v6, %v798_v6  ;;  %v754_v14 = vpop.permute.xlu0 %753 }
 0x2c7   : > { %v755_v20 = vsel %vm525_vm2, %v752_v7, %v754_v14  ;;  %v756_v23 = vsel %vm525_vm2, %v754_v14, %v752_v7 }
 0x2c8   : > { %v760_v11 = vpop.permute.xlu1 %759  ;;  %1028 = vmatprep.subr.msk.bf16.mxu0 %vm687_vm4, %v808_v13  ;;  %v813_v25 = vsel %vm687_vm4, %v807_v12, 0  ;;  %v793_v28 = vmul.f32 %v755_v20, %v1407_v33  ;;  %v794_v29 = vmul.f32 %v756_v23, %v1410_v34  ;;  %v758_v54 = vmul.f32 %v755_v20, %v1475_v18 }
 0x2c9   : > { %825 = vmatpush1.bf16.msra.mxu0 %v813_v25  ;;  %v757_v17 = vmul.f32 %v756_v23, %v1490_v35  ;;  %v1202_v20 = vmov 1966171168  }
 0x2ca   : > { %v762_v26 = vpop.permute.xlu0 %761  ;;  %v909_v23 = vunpack.c.l.s4 %v1202_v20 }
 0x2cb   : > { %v763_v24 = vsel %vm545_vm3, %v760_v11, %v762_v26  ;;  %v764_v27 = vsel %vm545_vm3, %v762_v26, %v760_v11 }
 0x2cc   : > { %v795_v22 = vmul.f32 %v763_v24, %v1415_v37  ;;  %v796_v36 = vmul.f32 %v764_v27, %v1418_v38  ;;  %v786_v41 = vpop.permute.xlu1 %785  ;;  %v784_v37 = vmul.f32 %v750_v60, %v1428_v42  ;;  %v765_v40 = vmul.f32 %v764_v27, %v1478_v19 }
 0x2ce   : > { %v805_v43 = vpack.c.bf16 %v795_v22, %v793_v28  ;;  %v788_v44 = vpop.permute.xlu0 %787  ;;  %v806_v32 = vpack.c.bf16 %v796_v36, %v794_v29  ;;  %v910_v29 = vunpack.c.0.s8 %v909_v23 }
 0x2cf   : > { %v789_v31 = vsel %vm618_vm5, %v786_v41, %v788_v44  ;;  %v790_v45 = vsel %vm618_vm5, %v788_v44, %v786_v41 }
 0x2d0   : > { %v791_v33 = vmul.f32 %v789_v31, %v1432_v47  ;;  %v792_v34 = vmul.f32 %v790_v45, %v1439_v51  ;;  %826 = vmatprep.subr.bf16.mxu0 %v806_v32  ;;  %v776_v48 = vpop.permute.xlu1 %775  ;;  %v774_v47 = vmul.f32 %v771_v3, %v1452_v59  ;;  %v766_v51 = vmul.f32 %v763_v24, %v1472_v10 }
 0x2d1   : > { %827 = vmatpush1.bf16.msra.mxu0 %v805_v43  ;;  %v799_v59 = vpack.c.bf16 %v765_v40, %v757_v17  ;;  %v913_v44 = vsub.s32 %v910_v29, %v1380_v16 }
 0x2d2   : > { %v803_v38 = vpack.c.bf16 %v791_v33, %v783_v46  ;;  %v778_v39 = vpop.permute.xlu0 %777  ;;  %v804_v50 = vpack.c.bf16 %v792_v34, %v784_v37  ;;  %v800_v57 = vpack.c.bf16 %v766_v51, %v758_v54 }
 0x2d3   : > { %v779_v52 = vsel %vm585_vm6, %v776_v48, %v778_v39  ;;  %v780_v30 = vsel %vm585_vm6, %v778_v39, %v776_v48 }
 0x2d4   : > { %v781_v53 = vmul.f32 %v780_v30, %v1466_v9  ;;  %v782_v42 = vmul.f32 %v779_v52, %v1469_v8  ;;  %828 = vmatprep.subr.bf16.mxu0 %v804_v50  ;;  %v452_v9 = vld [vmem:[%s1607_s7] sm:$0xf] }
 0x2d5   : > { %829 = vmatpush1.bf16.msra.mxu0 %v803_v38 }
 0x2d6   : > { %v801_v55 = vpack.c.bf16 %v781_v53, %v773_v49  ;;  %v802_v56 = vpack.c.bf16 %v782_v42, %v774_v47 }
 0x2d8   : > { %830 = vmatprep.subr.bf16.mxu0 %v802_v56 }
 0x2d9   : > { %831 = vmatpush1.bf16.msra.mxu0 %v801_v55 }
 0x2da   : > { %832 = vmatprep.subr.bf16.mxu0 %v800_v57 }
 0x2dd   : > { %833 = vmatpush1.bf16.msra.mxu0 %v799_v59  ;;  %v862_v8 = vpop.permute.xlu1 %861 }
 0x2df   : > { %v869_v58 = vpop.permute.xlu0 %868 }
 0x2e0   : > { %1029 = vmatmul.mubr.msk.bf16.vlgmr.msra.gmra.mxu0 %vm683_vm7, %v452_v9 }
 0x2e1   : > { %v878_v0 = vpop.permute.xlu1 %877 }
 0x2e3   : > { %v897_v24 = vpop.permute.xlu0 %896 }
 0x2e4   : > { %v902_v22 = vrot.slane %v897_v24, %v1386_v21 }
 0x3a0   : > { %v852_v10 = vpop.f32.mrf.mxu0 }
 0x3a1   : > { %v864_v18 = vmul.f32 %v862_v8, %v852_v10 }
 0x3a2   : > { %v854_v60 = vpop.f32.mrf.mxu0 }
 0x3a3   : > { %v871_v19 = vadd.f32 %v869_v58, %v864_v18  ;;  %v865_v61 = vmul.f32 %v862_v8, %v854_v60 }
 0x3a4   : > { %v856_v62 = vpop.f32.mrf.mxu0 }
 0x3a5   : > { %v873_v63 = vmax.f32 %v871_v19, 0.0  ;;  %v872_v35 = vadd.f32 %v869_v58, %v865_v61 }
 0x3a6   : > { %v857_v1 = vpop.f32.mrf.mxu0 }
 0x3a7   : > { %v880_v2 = vmul.f32 %v878_v0, %v873_v63  ;;  %v874_v3 = vmax.f32 %v872_v35, 0.0 }
 0x3a9   : > { %v882_v4 = vrot.slane %v880_v2, 4  ;;  %v881_v5 = vmul.f32 %v878_v0, %v874_v3 }
 0x3ab   : > { %v883_v6 = vadd.f32 %v882_v4, %v880_v2  ;;  %v888_v7 = vrot.slane %v881_v5, 4 }
 0x3ad   : > { %v884_v12 = vrot.slane %v883_v6, 2  ;;  %v889_v13 = vadd.f32 %v888_v7, %v881_v5 }
 0x3af   : > { %v885_v14 = vadd.f32 %v884_v12, %v883_v6  ;;  %v890_v11 = vrot.slane %v889_v13, 2 }
 0x3b1   : > { %v886_v25 = vrot.slane %v885_v14, 1  ;;  %v891_v26 = vadd.f32 %v890_v11, %v889_v13 }
 0x3b3   : > { %v887_v27 = vadd.f32 %v886_v25, %v885_v14  ;;  %v892_v28 = vrot.slane %v891_v26, 1 }
 0x3b5   : > { %v893_v36 = vadd.f32 %v892_v28, %v891_v26  ;;  %v903_v41 = vadd.f32 %v902_v22, %v887_v27 }
 0x3b7   : > { %v904_v43 = vadd.f32 %v902_v22, %v893_v36 }
 0x3b9   : > { %v907_v32 = vcombine.low %v903_v41, %v904_v43 }
 0x3bb   : > { %v914_v31 = vrot.slane %v907_v32, %v913_v44 }
 0x3bd   : > { %v921_v45 = vrot.slane %v914_v31, %v913_v44 }
 0x3bf   : > { %927 = vst.msk [vmem:[%s423_s20] sm:$0x3] %vm925_vm8, %v921_v45 }
 0x3c0   : > { %1140 = shalt.err (!%p1137_p0)
}
 0x3c1   : > { %s1141_s1 = scalar_lea.hbm %s941_s22, 32  ;;  %s1145_s20 = scalar_lea.hbm %s1612_s12, 64 }
 0x3c2   : > { %p1142_p1 = scmp.ne.s32.totalorder %s941_s22, %s1141_s1  ;;  %p1146_p4 = scmp.lt.s32.totalorder %s941_s22, %s1612_s12 }
 0x3c3   : > { %p1147_p7 = scmp.lt.s32.totalorder %s1145_s20, %s1141_s1 }
 0x3c4   : > { %p1143_p2 = pnand %p1142_p1, %p1310_p5 }
 0x3c5   : > { %p1148_p8 = por %p1147_p7, %p1146_p4 }
 0x3c6   : > { %p1144_p3 = pneg %p1143_p2 }
 0x3c8   : > { %p1149_p6 = pnand %p1148_p8, %p1144_p3 }
 0x3ca   : > { %1152 = shalt.err (!%p1149_p6)
}
 0x3cb   : > { %1041 = dma.vmem_to_hbm [thread:$0]  (%p1310_p5), %s944_s29, 32, %s941_s22, %s929_s30  }
 0x3cc PF: > { %p1053_p9 = scmp.ge.s32.totalorder %s1191_s26, 2  ;;  %s955_s0 = sand.u32 1, %s1179_s23  }
 0x3cd   : > { %p1620_p10 = scmp.ne.s32.totalorder %s1616_s15, 0  ;;  %s956_s17 = scalar_lea.sflag [#allocation5], %s955_s0 }
 0x3cf   : > { %p1048_p11 = pnand %p1053_p9, %p1620_p10 }
 0x3d1   : > { %p1049_p12 = pneg %p1048_p11 }
 0x3d3   : > { %1174 = dma.done.wait (%p1049_p12), %s956_s17, 32  }
 0x3d4   : > { %1176 = vsyncadd (%p1049_p12), %s956_s17, 4294967264  ;;  %p25_p13 = scmp.ge.s32.totalorder %s1297_s28, 4   ;;  %s1621_s23 = smov %s1183_s24 }
 0x3d5   : > { %s1622_s24 = smov %s1187_s25  ;;  %s1623_s25 = smov %s1308_s13 }
 0x3d6   : > { %s1624_s26 = smov %s1297_s28  ;;  %27 = sbr.rel (!%p25_p13) target bundleno = 7 (0x7), region = 116 }
 0x3db   :  { %961 = vsyncpa [#allocation4], 1 }
 0x3dc   :  { %963 = vsyncpa [#allocation4 + $0x1], 1 }
 0x3dd   :  { %964 = vsyncpa [#allocation5], 1 }
 0x3de   :  { %966 = vsyncpa [#allocation5 + $0x1], 1 }

</bundles_post_ra>
